<compile_context>
chip_gen: v6e
topology: v6e:2x2x1
jax: 0.10.0
libtpu: 0.0.40
codegen_flags: <defaults>
</compile_context>

<pallas_src>
import functools

import jax
import jax.numpy as jnp
from jax.experimental import pallas as pl
from jax.experimental.pallas import tpu as pltpu

_LANES = 128
_SUBLANES = 8
# Single-block path while the padded slab is <= 8192 rows x 128 lanes x 4 B = 4 MiB.
_MAX_SINGLE_BLOCK_ROWS = 8192
# Tiled path: 4096 rows x 128 x 4 B = 2 MiB per block (double-buffered input +
# 2 MiB accumulator scratch ~ 6 MiB, safe on v5e/v6e/v7x scoped VMEM).
_TILED_ROW_BLOCK = 4096


def _sum_whole_kernel(kl_ref, sum_ref):
    """Single invocation: whole lane-dense slab lives in VMEM, one reduce."""
    sum_ref[0] = jnp.sum(kl_ref[...])


def _sum_tiled_kernel(kl_ref, sum_ref, acc_ref):
    """Grid axis 0 walks row-blocks (reduction axis -> 'arbitrary').

    kl_ref  : VMEM (row_block, 128) f32  -> current row-block
    sum_ref : SMEM (1,) f32              -> scalar sum result
    acc_ref : VMEM (row_block, 128) f32  -> vector accumulator (VPU adds only)
    """
    i = pl.program_id(0)

    @pl.when(i == 0)
    def _init():
        acc_ref[...] = jnp.zeros_like(acc_ref)

    # Pure element-wise VPU add per step; no per-step cross-lane reduce and no
    # per-step scalar/SMEM round-trip.
    acc_ref[...] += kl_ref[...]

    @pl.when(i == pl.num_programs(0) - 1)
    def _finalize():
        sum_ref[0] = jnp.sum(acc_ref[...])


def _choose_row_block(n_elems):
    rows = -(-n_elems // _LANES)                      # ceil(n / 128)
    rows = _SUBLANES * (-(-rows // _SUBLANES))        # round up to multiple of 8
    if rows <= _MAX_SINGLE_BLOCK_ROWS:
        return rows                                   # -> single block, grid collapsed
    return _TILED_ROW_BLOCK


@functools.partial(jax.jit, static_argnames=("row_block",))
def _annealed_vae_loss(kl, gamma, c, *, row_block):
    # Lane-dense layout: flatten, zero-pad to a multiple of row_block*128,
    # reshape to [rows, 128].  Zero padding does not change the sum.
    flat = jnp.ravel(kl).astype(jnp.float32)
    n = flat.shape[0]
    chunk = row_block * _LANES
    pad = (-n) % chunk
    if pad:
        flat = jnp.concatenate([flat, jnp.zeros((pad,), jnp.float32)])
    kl2d = flat.reshape(-1, _LANES)
    rows = kl2d.shape[0]
    num_blocks = rows // row_block

    if num_blocks == 1:
        # Whole tensor in one kernel invocation: no grid, no accumulator.
        s = pl.pallas_call(
            _sum_whole_kernel,
            out_shape=jax.ShapeDtypeStruct((1,), jnp.float32),
            in_specs=[pl.BlockSpec(memory_space=pltpu.MemorySpace.VMEM)],
            out_specs=pl.BlockSpec(memory_space=pltpu.MemorySpace.SMEM),
        )(kl2d)[0]
    else:
        s = pl.pallas_call(
            _sum_tiled_kernel,
            out_shape=jax.ShapeDtypeStruct((1,), jnp.float32),
            grid=(num_blocks,),
            in_specs=[pl.BlockSpec((row_block, _LANES), lambda i: (i, 0))],
            out_specs=pl.BlockSpec(memory_space=pltpu.MemorySpace.SMEM),
            scratch_shapes=[pltpu.VMEM((row_block, _LANES), jnp.float32)],
            compiler_params=pltpu.CompilerParams(
                dimension_semantics=("arbitrary",),  # reduction axis
            ),
        )(kl2d)[0]

    # Scalar epilogue (gamma * |sum - c|) as plain XLA scalar math.
    return gamma * jnp.abs(s - c)


class AnnealedVAE:
    """AnnealedVAE regularizer (Eq. 8 of https://arxiv.org/abs/1804.03599)."""

    def __init__(self, gamma, c_max, iteration_threshold):
        self.gamma = float(gamma)
        self.c_max = float(c_max)
        self.iteration_threshold = float(iteration_threshold)
        self.c = 0.0
        self.delta = self.c_max / self.iteration_threshold

    def forward(self, data_batch, model, kl, z_mean, z_logvar, z_sampled):
        del data_batch, model, z_mean, z_logvar, z_sampled  # unused, as in PyTorch
        c = min(self.c_max, self.c + self.delta)
        self.c += self.delta  # stateful capacity annealing (host-side scalar)
        kl = jnp.asarray(kl, jnp.float32)
        row_block = _choose_row_block(kl.size)
        return _annealed_vae_loss(
            kl, jnp.float32(self.gamma), jnp.float32(c), row_block=row_block
        )


if __name__ == "__main__":
    key = jax.random.PRNGKey(0)
    k_kl, k_dat, k_mu, k_lv, k_z, k_big = jax.random.split(key, 6)

    B, L = 16, 10            # batch=16, num_latent=10 (typical disentanglement_lib)
    C, H, W = 4, 16, 16      # dummy data_batch, NCHW-shaped (unused by forward)

    kl = jax.random.uniform(k_kl, (B, L), jnp.float32)
    data_batch = jax.random.normal(k_dat, (B, C, H, W), jnp.float32)
    z_mean = jax.random.normal(k_mu, (B, L), jnp.float32)
    z_logvar = jax.random.normal(k_lv, (B, L), jnp.float32)
    z_sampled = jax.random.normal(k_z, (B, L), jnp.float32)

    reg = AnnealedVAE(gamma=1000.0, c_max=25.0, iteration_threshold=100000)

    # Run twice to exercise the annealed-capacity state update (single-block path).
    expected_c1 = min(reg.c_max, 0.0 + reg.delta)
    loss1 = reg.forward(data_batch, None, kl, z_mean, z_logvar, z_sampled)
    expected_c2 = min(reg.c_max, reg.delta + reg.delta)
    loss2 = reg.forward(data_batch, None, kl, z_mean, z_logvar, z_sampled)
    jax.block_until_ready((loss1, loss2))

    ref1 = reg.gamma * jnp.abs(jnp.sum(kl) - expected_c1)
    ref2 = reg.gamma * jnp.abs(jnp.sum(kl) - expected_c2)
    assert jnp.allclose(loss1, ref1, rtol=1e-5, atol=1e-4), (loss1, ref1)
    assert jnp.allclose(loss2, ref2, rtol=1e-5, atol=1e-4), (loss2, ref2)

    # Also exercise the tiled (multi-block) reduction path with a small forced
    # row_block so the kernel with the VMEM vector accumulator is covered.
    kl_big = jax.random.uniform(k_big, (32, 128), jnp.float32)  # 32 rows -> 4 blocks of 8
    loss_t = _annealed_vae_loss(
        kl_big, jnp.float32(1.0), jnp.float32(0.0), row_block=8
    )
    jax.block_until_ready(loss_t)
    ref_t = jnp.abs(jnp.sum(kl_big))
    assert jnp.allclose(loss_t, ref_t, rtol=1e-5, atol=1e-4), (loss_t, ref_t)

    print("KERNEL_OK")
</pallas_src>

<mosaic_0001>
module attributes {stable_mosaic.version = 11 : i64} {
  func.func @_sum_whole_kernel(%arg0: memref<8x128xf32, #tpu.memory_space<vmem>>, %arg1: memref<1xf32, #tpu.memory_space<smem>>) attributes {dimension_semantics = [], scalar_prefetch = 0 : i64, scratch_operands = 0 : i64, tpu.core_type = #tpu.core_type<tc>} {
    %c0 = arith.constant 0 : index
    %c0_0 = arith.constant 0 : index
    %0 = vector.load %arg0[%c0, %c0_0] : memref<8x128xf32, #tpu.memory_space<vmem>>, vector<8x128xf32>
    %1 = vector.shape_cast %0 : vector<8x128xf32> to vector<1x8x128xf32>
    %cst = arith.constant dense<0.000000e+00> : vector<1xf32>
    %2 = vector.multi_reduction <add>, %1, %cst [1, 2] : vector<1x8x128xf32> to vector<1xf32>
    %3 = vector.shape_cast %2 : vector<1xf32> to vector<1x1x1xf32>
    %4 = vector.extract %3[0, 0, 0] : f32 from vector<1x1x1xf32>
    %c0_1 = arith.constant 0 : index
    %5 = memref.load %arg1[%c0_1] : memref<1xf32, #tpu.memory_space<smem>>
    memref.store %4, %arg1[%c0_1] : memref<1xf32, #tpu.memory_space<smem>>
    return
  }
}

</mosaic_0001>

<bundles_post_ra>
// kernel: _annealed_vae_loss.1
= control target key start
LH: loop header
LB: loop body
LE: loop exit
PB: predicated region body
PF: predicated region fallthrough
CT: control target
= control target key end

     0   :  { %s64_s0 = inlined_call_operand.vmem [shape: f32[8,128], index: 0, kind: input, shape index: {}]   ;;  %s65_s1 = inlined_call_operand.hbm [shape: f32[1], index: 1, kind: output, shape index: {}]  }
   0x1   :  { %v9_v0 = vld [vmem:[%s64_s0] sm:$0xff] }
   0x2   :  { %6 = vsyncpa [#allocation3], 0  ;;  %10 = vadd.xlane.f32.xlu0 %v9_v0  ;;  %s47_s9 = smov [#allocation2]  }
  0x8b   :  { %v11_v1 = vpop.xlane.xlu0 %10 }
  0x8c   :  { %v12_v2 = vrot.slane %v11_v1, 4 }
  0x8e   :  { %v13_v3 = vadd.f32 %v12_v2, %v11_v1 }
  0x90   :  { %v14_v4 = vrot.slane %v13_v3, 2 }
  0x92   :  { %v15_v5 = vadd.f32 %v14_v4, %v13_v3 }
  0x94   :  { %v16_v6 = vrot.slane %v15_v5, 1 }
  0x96   :  { %v17_v7 = vadd.f32 %v16_v6, %v15_v5 }
  0x98   :  { %34 = vpush %v17_v7 }
  0xc9   :  { %s35_s8 = spop %34 }
  0xca   :  { %20 = sst [smem:[#allocation2]] %s35_s8 }
  0xcb   :  { %28 = dma.smem_to_hbm %s47_s9, 16, %s65_s1, [#allocation3]  }
  0xcc   :  { %45 = dma.done.wait [#allocation3], 16  }
  0xcd   :  { %46 = vsyncadd [#allocation3], 4294967280 }
  0xce   :  { %32 = sfence }
  0xcf   :  { %33 = vsyncpa [#allocation3], 1 }

</bundles_post_ra>
